<compile_context>
chip_gen: v7x
topology: tpu7x:2x2x1
jax: 0.10.0
libtpu: 0.0.40
codegen_flags: <defaults>
</compile_context>

<pallas_src>
import functools

import jax
import jax.numpy as jnp
from jax.experimental import pallas as pl
from jax.experimental.pallas import tpu as pltpu

_LANE = 128
_SUBLANE = 8


def _round_up(n, m):
    return ((n + m - 1) // m) * m


def subnet_kernel(x_ref, g_ref, be_ref,
                  w1_ref, b1_ref, w2_ref, b2_ref, w3_ref, b3_ref,
                  o_ref, *, n_valid_rows):
    x = x_ref[...]
    if x.dtype != jnp.float32:            # trace-time check: no redundant cast
        x = x.astype(jnp.float32)

    b_pad = x.shape[0]

    # --- BatchNorm1d statistics (training-mode batch stats, biased var) ---
    if n_valid_rows == b_pad:
        mean = jnp.sum(x, axis=0, keepdims=True) * (1.0 / n_valid_rows)
        diff = x - mean
        var = jnp.sum(diff * diff, axis=0, keepdims=True) * (1.0 / n_valid_rows)
    else:
        # Padded batch rows (zeros) must not pollute the statistics.
        row_ids = jax.lax.broadcasted_iota(jnp.int32, x.shape, 0)
        mask = (row_ids < n_valid_rows).astype(jnp.float32)
        mean = jnp.sum(x * mask, axis=0, keepdims=True) * (1.0 / n_valid_rows)
        diff = (x - mean) * mask
        var = jnp.sum(diff * diff, axis=0, keepdims=True) * (1.0 / n_valid_rows)

    inv_std = jax.lax.rsqrt(var + 1e-5)

    # Fold BN affine into a single multiply-add per element.
    scale = g_ref[...] * inv_std                       # (1, in_pad)
    shift = be_ref[...] - mean * scale                 # (1, in_pad)
    normed = x * scale + shift                         # (B_pad, in_pad)

    # --- Dropout: identity (eval semantics) ---
    dropped = normed

    # --- three Linear + ReLU layers, full 128-lane MXU passes ---
    y1 = jnp.maximum(
        jnp.dot(dropped, w1_ref[...], preferred_element_type=jnp.float32)
        + b1_ref[...], 0.0)
    y2 = jnp.maximum(
        jnp.dot(y1, w2_ref[...], preferred_element_type=jnp.float32)
        + b2_ref[...], 0.0)
    y3 = jnp.maximum(
        jnp.dot(y2, w3_ref[...], preferred_element_type=jnp.float32)
        + b3_ref[...], 0.0)

    o_ref[...] = y3.astype(o_ref.dtype)


def subnet_forward(x, gamma, beta, w1, b1, w2, b2, w3, b3):
    """x: (B, in_size). Linear weights given PyTorch-style as (out, in)."""
    B, in_size = x.shape
    hidden = w1.shape[0]

    # Pad all feature dims to 128 lanes and the batch to 8 sublanes so every
    # tile is vreg/MXU aligned and the output store is unmasked 128-wide.
    B_pad = _round_up(B, _SUBLANE)
    in_pad = _round_up(in_size, _LANE)
    h_pad = _round_up(hidden, _LANE)

    f32 = jnp.float32
    x_p = jnp.zeros((B_pad, in_pad), f32).at[:B, :in_size].set(x.astype(f32))
    g_p = jnp.zeros((1, in_pad), f32).at[0, :in_size].set(gamma.astype(f32))
    be_p = jnp.zeros((1, in_pad), f32).at[0, :in_size].set(beta.astype(f32))

    # Pre-transpose weights to (in, out) and zero-pad; padded rows/cols
    # contribute exactly zero to the valid output columns.
    w1t = jnp.zeros((in_pad, h_pad), f32).at[:in_size, :hidden].set(w1.T.astype(f32))
    w2t = jnp.zeros((h_pad, h_pad), f32).at[:hidden, :hidden].set(w2.T.astype(f32))
    w3t = jnp.zeros((h_pad, h_pad), f32).at[:hidden, :hidden].set(w3.T.astype(f32))
    b1r = jnp.zeros((1, h_pad), f32).at[0, :hidden].set(b1.astype(f32))
    b2r = jnp.zeros((1, h_pad), f32).at[0, :hidden].set(b2.astype(f32))
    b3r = jnp.zeros((1, h_pad), f32).at[0, :hidden].set(b3.astype(f32))

    full = lambda shape: pl.BlockSpec(shape, lambda: tuple(0 for _ in shape))

    out_pad = pl.pallas_call(
        functools.partial(subnet_kernel, n_valid_rows=B),
        out_shape=jax.ShapeDtypeStruct((B_pad, h_pad), x.dtype),
        grid=(),
        in_specs=[
            full((B_pad, in_pad)),       # x
            full((1, in_pad)),           # gamma
            full((1, in_pad)),           # beta
            full((in_pad, h_pad)),       # W1^T
            full((1, h_pad)),            # b1
            full((h_pad, h_pad)),        # W2^T
            full((1, h_pad)),            # b2
            full((h_pad, h_pad)),        # W3^T
            full((1, h_pad)),            # b3
        ],
        out_specs=full((B_pad, h_pad)),
    )(x_p, g_p, be_p, w1t, b1r, w2t, b2r, w3t, b3r)

    return out_pad[:B, :hidden]


if __name__ == "__main__":
    batch, in_size, hidden = 8, 16, 32

    key = jax.random.PRNGKey(0)
    ks = jax.random.split(key, 10)

    x = jax.random.normal(ks[0], (batch, in_size), dtype=jnp.float32)

    # Deterministic parameter init (shapes match PyTorch module __init__).
    gamma = jnp.ones((in_size,), jnp.float32)
    beta = jnp.zeros((in_size,), jnp.float32)

    def lin_init(kw, kb, fan_in, fan_out):
        bound = 1.0 / (fan_in ** 0.5)
        w = jax.random.uniform(kw, (fan_out, fan_in), jnp.float32, -bound, bound)
        b = jax.random.uniform(kb, (fan_out,), jnp.float32, -bound, bound)
        return w, b

    w1, b1 = lin_init(ks[1], ks[2], in_size, hidden)
    w2, b2 = lin_init(ks[3], ks[4], hidden, hidden)
    w3, b3 = lin_init(ks[5], ks[6], hidden, hidden)

    out = subnet_forward(x, gamma, beta, w1, b1, w2, b2, w3, b3)
    out = jax.block_until_ready(out)

    # Reference check in plain JAX.
    mean = jnp.mean(x, axis=0, keepdims=True)
    var = jnp.mean((x - mean) ** 2, axis=0, keepdims=True)
    normed = (x - mean) / jnp.sqrt(var + 1e-5) * gamma + beta
    r1 = jnp.maximum(normed @ w1.T + b1, 0.0)
    r2 = jnp.maximum(r1 @ w2.T + b2, 0.0)
    ref = jnp.maximum(r2 @ w3.T + b3, 0.0)
    assert out.shape == (batch, hidden), "bad output shape"
    assert jnp.allclose(out, ref, atol=1e-5, rtol=1e-5), "mismatch vs reference"

    print("KERNEL_OK")
</pallas_src>

<mosaic_0001>
module attributes {stable_mosaic.version = 11 : i64} {
  func.func @subnet_kernel(%arg0: memref<8x128xf32, #tpu.memory_space<vmem>>, %arg1: memref<1x128xf32, #tpu.memory_space<vmem>>, %arg2: memref<1x128xf32, #tpu.memory_space<vmem>>, %arg3: memref<128x128xf32, #tpu.memory_space<vmem>>, %arg4: memref<1x128xf32, #tpu.memory_space<vmem>>, %arg5: memref<128x128xf32, #tpu.memory_space<vmem>>, %arg6: memref<1x128xf32, #tpu.memory_space<vmem>>, %arg7: memref<128x128xf32, #tpu.memory_space<vmem>>, %arg8: memref<1x128xf32, #tpu.memory_space<vmem>>, %arg9: memref<8x128xf32, #tpu.memory_space<vmem>>) attributes {dimension_semantics = [], scalar_prefetch = 0 : i64, scratch_operands = 0 : i64, tpu.core_type = #tpu.core_type<tc>} {
    %c0 = arith.constant 0 : index
    %c0_0 = arith.constant 0 : index
    %0 = vector.load %arg0[%c0, %c0_0] : memref<8x128xf32, #tpu.memory_space<vmem>>, vector<8x128xf32>
    %cst = arith.constant dense<0.000000e+00> : vector<128xf32>
    %1 = vector.multi_reduction <add>, %0, %cst [0] : vector<8x128xf32> to vector<128xf32>
    %2 = vector.shape_cast %1 : vector<128xf32> to vector<1x128xf32>
    %cst_1 = arith.constant 1.250000e-01 : f32
    %3 = vector.broadcast %cst_1 : f32 to vector<1x128xf32>
    %4 = arith.mulf %2, %3 : vector<1x128xf32>
    %5 = vector.broadcast %4 : vector<1x128xf32> to vector<8x128xf32>
    %6 = arith.subf %0, %5 : vector<8x128xf32>
    %7 = arith.mulf %6, %6 : vector<8x128xf32>
    %cst_2 = arith.constant dense<0.000000e+00> : vector<128xf32>
    %8 = vector.multi_reduction <add>, %7, %cst_2 [0] : vector<8x128xf32> to vector<128xf32>
    %9 = vector.shape_cast %8 : vector<128xf32> to vector<1x128xf32>
    %cst_3 = arith.constant 1.250000e-01 : f32
    %10 = vector.broadcast %cst_3 : f32 to vector<1x128xf32>
    %11 = arith.mulf %9, %10 : vector<1x128xf32>
    %cst_4 = arith.constant 9.99999974E-6 : f32
    %12 = vector.broadcast %cst_4 : f32 to vector<1x128xf32>
    %13 = arith.addf %11, %12 : vector<1x128xf32>
    %14 = math.rsqrt %13 : vector<1x128xf32>
    %c0_5 = arith.constant 0 : index
    %c0_6 = arith.constant 0 : index
    %15 = vector.load %arg1[%c0_5, %c0_6] : memref<1x128xf32, #tpu.memory_space<vmem>>, vector<1x128xf32>
    %16 = arith.mulf %15, %14 : vector<1x128xf32>
    %c0_7 = arith.constant 0 : index
    %c0_8 = arith.constant 0 : index
    %17 = vector.load %arg2[%c0_7, %c0_8] : memref<1x128xf32, #tpu.memory_space<vmem>>, vector<1x128xf32>
    %18 = arith.mulf %4, %16 : vector<1x128xf32>
    %19 = arith.subf %17, %18 : vector<1x128xf32>
    %20 = vector.broadcast %16 : vector<1x128xf32> to vector<8x128xf32>
    %21 = arith.mulf %0, %20 : vector<8x128xf32>
    %22 = vector.broadcast %19 : vector<1x128xf32> to vector<8x128xf32>
    %23 = arith.addf %21, %22 : vector<8x128xf32>
    %c0_9 = arith.constant 0 : index
    %c0_10 = arith.constant 0 : index
    %24 = vector.load %arg3[%c0_9, %c0_10] : memref<128x128xf32, #tpu.memory_space<vmem>>, vector<128x128xf32>
    %cst_11 = arith.constant dense<0.000000e+00> : vector<8x128xf32>
    %25 = tpu.matmul %23, %24, %cst_11 {dimension_numbers = #tpu.dot_dimension_numbers<[1], [0], [0], [1], [0, 0, 1, 1], [], []>} : vector<8x128xf32>, vector<128x128xf32>, vector<8x128xf32> -> vector<8x128xf32>
    %c0_12 = arith.constant 0 : index
    %c0_13 = arith.constant 0 : index
    %26 = vector.load %arg4[%c0_12, %c0_13] : memref<1x128xf32, #tpu.memory_space<vmem>>, vector<1x128xf32>
    %27 = vector.broadcast %26 : vector<1x128xf32> to vector<8x128xf32>
    %28 = arith.addf %25, %27 : vector<8x128xf32>
    %cst_14 = arith.constant 0.000000e+00 : f32
    %29 = vector.broadcast %cst_14 : f32 to vector<8x128xf32>
    %30 = arith.maximumf %28, %29 : vector<8x128xf32>
    %c0_15 = arith.constant 0 : index
    %c0_16 = arith.constant 0 : index
    %31 = vector.load %arg5[%c0_15, %c0_16] : memref<128x128xf32, #tpu.memory_space<vmem>>, vector<128x128xf32>
    %cst_17 = arith.constant dense<0.000000e+00> : vector<8x128xf32>
    %32 = tpu.matmul %30, %31, %cst_17 {dimension_numbers = #tpu.dot_dimension_numbers<[1], [0], [0], [1], [0, 0, 1, 1], [], []>} : vector<8x128xf32>, vector<128x128xf32>, vector<8x128xf32> -> vector<8x128xf32>
    %c0_18 = arith.constant 0 : index
    %c0_19 = arith.constant 0 : index
    %33 = vector.load %arg6[%c0_18, %c0_19] : memref<1x128xf32, #tpu.memory_space<vmem>>, vector<1x128xf32>
    %34 = vector.broadcast %33 : vector<1x128xf32> to vector<8x128xf32>
    %35 = arith.addf %32, %34 : vector<8x128xf32>
    %cst_20 = arith.constant 0.000000e+00 : f32
    %36 = vector.broadcast %cst_20 : f32 to vector<8x128xf32>
    %37 = arith.maximumf %35, %36 : vector<8x128xf32>
    %c0_21 = arith.constant 0 : index
    %c0_22 = arith.constant 0 : index
    %38 = vector.load %arg7[%c0_21, %c0_22] : memref<128x128xf32, #tpu.memory_space<vmem>>, vector<128x128xf32>
    %cst_23 = arith.constant dense<0.000000e+00> : vector<8x128xf32>
    %39 = tpu.matmul %37, %38, %cst_23 {dimension_numbers = #tpu.dot_dimension_numbers<[1], [0], [0], [1], [0, 0, 1, 1], [], []>} : vector<8x128xf32>, vector<128x128xf32>, vector<8x128xf32> -> vector<8x128xf32>
    %c0_24 = arith.constant 0 : index
    %c0_25 = arith.constant 0 : index
    %40 = vector.load %arg8[%c0_24, %c0_25] : memref<1x128xf32, #tpu.memory_space<vmem>>, vector<1x128xf32>
    %41 = vector.broadcast %40 : vector<1x128xf32> to vector<8x128xf32>
    %42 = arith.addf %39, %41 : vector<8x128xf32>
    %cst_26 = arith.constant 0.000000e+00 : f32
    %43 = vector.broadcast %cst_26 : f32 to vector<8x128xf32>
    %44 = arith.maximumf %42, %43 : vector<8x128xf32>
    %c0_27 = arith.constant 0 : index
    %c0_28 = arith.constant 0 : index
    %45 = vector.load %arg9[%c0_27, %c0_28] : memref<8x128xf32, #tpu.memory_space<vmem>>, vector<8x128xf32>
    tpu.vector_store %arg9[%c0_27, %c0_28], %44 {strides = array<i32>} : memref<8x128xf32, #tpu.memory_space<vmem>>, vector<8x128xf32>,
    return
  }
}

</mosaic_0001>

<bundles_post_ra>
// kernel: tpu_custom_call.1
= control target key start
LH: loop header
LB: loop body
LE: loop exit
PB: predicated region body
PF: predicated region fallthrough
CT: control target
= control target key end

     0   :  { %14 = vsyncpa [#allocation3], 0  ;;  %s965_s0 = inlined_call_operand.hbm [shape: f32[8,128], index: 0, kind: input, shape index: {}]   ;;  %s966_s1 = inlined_call_operand.vmem [shape: f32[1,128], index: 1, kind: input, shape index: {}]   ;;  %s967_s2 = inlined_call_operand.vmem [shape: f32[1,128], index: 2, kind: input, shape index: {}]   ;;  %s968_s3 = inlined_call_operand.hbm [shape: f32[128,128], index: 3, kind: input, shape index: {}]   ;;  %s969_s4 = inlined_call_operand.vmem [shape: f32[1,128], index: 4, kind: input, shape index: {}]   ;;  %s970_s5 = inlined_call_operand.hbm [shape: f32[128,128], index: 5, kind: input, shape index: {}]   ;;  %s971_s6 = inlined_call_operand.vmem [shape: f32[1,128], index: 6, kind: input, shape index: {}]   ;;  %s972_s7 = inlined_call_operand.hbm [shape: f32[128,128], index: 7, kind: input, shape index: {}]   ;;  %s973_s8 = inlined_call_operand.vmem [shape: f32[1,128], index: 8, kind: input, shape index: {}]   ;;  %s974_s9 = inlined_call_operand.hbm [shape: f32[8,128], index: 9, kind: output, shape index: {}]  }
   0x1   :  { %15 = vsyncpa [#allocation6], 0 }
   0x2   :  { %16 = vsyncpa [#allocation9], 0 }
   0x3   :  { %17 = vsyncpa [#allocation4], 0  ;;  %s785_s30 = smov [#allocation5]   ;;  %s667_s13 = scalar_lea.hbm %s968_s3, 2048 }
   0x4   :  { %s37_s10 = sshll.u32 %s785_s30, 4  ;;  %p668_p0 = scmp.ne.s32.totalorder %s968_s3, %s667_s13  ;;  %s38_s10 = int_to_ptr.vmem [resolvable:$true] %s37_s10 }
   0x5   :  { %p671_p1 = scmp.lt.u32.totalorder %s667_s13, %s968_s3 }
   0x7   :  { %p673_p2 = pnand %p671_p1, %p668_p0 }
   0x9   :  { %676 = shalt.err (!%p673_p2)
}
   0xa   :  { %s677_s18 = scalar_lea.vmem %s38_s10, 2048  ;;  %p682_p4 = scmp.lt.s32.totalorder %s38_s10, %s38_s10 }
   0xb   :  { %p678_p3 = scmp.ne.s32.totalorder %s38_s10, %s677_s18  ;;  %p683_p5 = scmp.lt.s32.totalorder %s677_s18, %s677_s18 }
   0xd   :  { %p684_p6 = por %p683_p5, %p682_p4 }
   0xf   :  { %p685_p7 = pnand %p684_p6, %p678_p3 }
  0x11   :  { %688 = shalt.err (!%p685_p7)
}
  0x12   :  { %s786_s19 = smov 128   ;;  %s787_s20 = smov 8  }
  0x13   :  { %43 = dma.hbm_to_vmem [thread:$0]  %s968_s3, 2048, %s38_s10, [#allocation6], %s786_s19, %s786_s19, %s787_s20  }
  0x14   :  { %s788_s23 = smov [#allocation2]   ;;  %s789_s25 = smov [#allocation7]  }
  0x15   :  { %s24_s24 = sshll.u32 %s788_s23, 4  ;;  %s51_s26 = sshll.u32 %s789_s25, 4  ;;  %s25_s24 = int_to_ptr.vmem [resolvable:$true] %s24_s24  ;;  %s52_s26 = int_to_ptr.vmem [resolvable:$true] %s51_s26 }
  0x16   :  { %s689_s29 = scalar_lea.hbm %s965_s0, 128 }
  0x17   :  { %p690_p8 = scmp.ne.s32.totalorder %s965_s0, %s689_s29  ;;  %p693_p9 = scmp.lt.u32.totalorder %s689_s29, %s965_s0 }
  0x19   :  { %p695_p10 = pnand %p693_p9, %p690_p8 }
  0x1b   :  { %698 = shalt.err (!%p695_p10)
}
  0x1c   :  { %s699_s3 = scalar_lea.vmem %s25_s24, 128  ;;  %p704_p12 = scmp.lt.s32.totalorder %s25_s24, %s25_s24 }
  0x1d   :  { %p700_p11 = scmp.ne.s32.totalorder %s25_s24, %s699_s3  ;;  %p705_p13 = scmp.lt.s32.totalorder %s699_s3, %s699_s3 }
  0x1f   :  { %p706_p0 = por %p705_p13, %p704_p12 }
  0x21   :  { %p707_p1 = pnand %p706_p0, %p700_p11 }
  0x23   :  { %710 = shalt.err (!%p707_p1)
}
  0x24   :  { %27 = dma.hbm_to_vmem [thread:$0]  %s965_s0, 128, %s25_s24, [#allocation3]  }
  0x25   :  { %s711_s17 = scalar_lea.hbm %s970_s5, 2048 }
  0x26   :  { %p712_p2 = scmp.ne.s32.totalorder %s970_s5, %s711_s17  ;;  %p715_p3 = scmp.lt.u32.totalorder %s711_s17, %s970_s5 }
  0x28   :  { %p717_p4 = pnand %p715_p3, %p712_p2 }
  0x2a   :  { %720 = shalt.err (!%p717_p4)
}
  0x2b   :  { %s721_s25 = scalar_lea.vmem %s52_s26, 2048  ;;  %p726_p6 = scmp.lt.s32.totalorder %s52_s26, %s52_s26 }
  0x2c   :  { %p722_p5 = scmp.ne.s32.totalorder %s52_s26, %s721_s25  ;;  %p727_p7 = scmp.lt.s32.totalorder %s721_s25, %s721_s25 }
  0x2e   :  { %p728_p8 = por %p727_p7, %p726_p6 }
  0x30   :  { %p729_p9 = pnand %p728_p8, %p722_p5 }
  0x32   :  { %732 = shalt.err (!%p729_p9)
}
  0x33   :  { %57 = dma.hbm_to_vmem [thread:$0]  %s970_s5, 2048, %s52_s26, [#allocation6], %s786_s19, %s786_s19, %s787_s20  }
  0x34   :  { %s790_s27 = smov [#allocation8]   ;;  %s733_s11 = scalar_lea.hbm %s972_s7, 2048 }
  0x35   :  { %s65_s28 = sshll.u32 %s790_s27, 4  ;;  %p734_p10 = scmp.ne.s32.totalorder %s972_s7, %s733_s11  ;;  %s66_s28 = int_to_ptr.vmem [resolvable:$true] %s65_s28 }
  0x36   :  { %p737_p11 = scmp.lt.u32.totalorder %s733_s11, %s972_s7 }
  0x38   :  { %p739_p12 = pnand %p737_p11, %p734_p10 }
  0x3a   :  { %742 = shalt.err (!%p739_p12)
}
  0x3b   :  { %s743_s14 = scalar_lea.vmem %s66_s28, 2048  ;;  %p748_p0 = scmp.lt.s32.totalorder %s66_s28, %s66_s28 }
  0x3c   :  { %p744_p13 = scmp.ne.s32.totalorder %s66_s28, %s743_s14  ;;  %p749_p1 = scmp.lt.s32.totalorder %s743_s14, %s743_s14 }
  0x3e   :  { %p750_p2 = por %p749_p1, %p748_p0 }
  0x40   :  { %p751_p3 = pnand %p750_p2, %p744_p13 }
  0x42   :  { %754 = shalt.err (!%p751_p3)
}
  0x43   :  { %71 = dma.hbm_to_vmem [thread:$0]  %s972_s7, 2048, %s66_s28, [#allocation9], %s786_s19, %s786_s19, %s787_s20  }
  0x44   :  { %777 = dma.done.wait [#allocation3], 128  }
  0x45   :  { %778 = vsyncadd [#allocation3], 4294967168 }
  0x46   :  { %779 = dma.done.wait [#allocation6], 4096  }
  0x47   :  { %780 = vsyncadd [#allocation6], 4294963200 }
  0x48   :  { %781 = dma.done.wait [#allocation9], 2048  }
  0x49   :  { %782 = vsyncadd [#allocation9], 4294965248  ;;  %v791_v0 = vmov 0.0|0.0   ;;  %vm792_vm0 = vmmov 0   ;;  %v793_v1 = vmov 0.0   ;;  %v124_v2 = vld [vmem:[#allocation5] sm:$0xff] }
  0x4a   :  { %583 = vmatprep.subr.bf16.mxu0 %v791_v0  ;;  %510 = vmatprep.mubr.msk.f32.mxu0 %vm792_vm0, %v793_v1  ;;  %v125_v3 = vld [vmem:[#allocation5 + $0x8] sm:$0xff]  ;;  %v126_v4 = vld [vmem:[#allocation5 + $0x10] sm:$0xff]  ;;  %v127_v6 = vld [vmem:[#allocation5 + $0x18] sm:$0xff]  ;;  %s794_s21 = smov [#allocation10]  }
  0x4b   :  { %607 = vmatprep.subr.bf16.mxu1 %v791_v0  ;;  %545 = vmatprep.mubr.msk.f32.mxu1 %vm792_vm0, %v793_v1  ;;  %v584_v5 = vpack.c.bf16 %v125_v3, %v124_v2  ;;  %v587_v7 = vpack.c.bf16 %v127_v6, %v126_v4  ;;  %v128_v8 = vld [vmem:[#allocation5 + $0x20] sm:$0xff]  ;;  %v129_v9 = vld [vmem:[#allocation5 + $0x28] sm:$0xff]  ;;  %v909_v10 = vld [vmem:[#allocation2] sm:$0xff]  ;;  %v111_v3 = vlaneseq  ;;  %s413_s22 = sshll.u32 %s794_s21, 4  ;;  %s414_s22 = int_to_ptr.vmem [resolvable:$true] %s413_s22 }
  0x4c   :  { %v87_v11 = vrot.slane %v909_v10, 4  ;;  %v218_v12 = vld [vmem:[#allocation7] sm:$0xff]  ;;  %v219_v13 = vld [vmem:[#allocation7 + $0x8] sm:$0xff]  ;;  %v590_v14 = vpack.c.bf16 %v129_v9, %v128_v8  ;;  %v220_v16 = vld [vmem:[#allocation7 + $0x10] sm:$0xff]  ;;  %s755_s23 = scalar_lea.vmem %s414_s22, 128  ;;  %p760_p5 = scmp.lt.s32.totalorder %s414_s22, %s414_s22 }
  0x4d   :  { %585 = vmatpush3.bf16.msra.mxu0 %v584_v5  ;;  %v608_v15 = vpack.c.bf16 %v219_v13, %v218_v12  ;;  %v221_v17 = vld [vmem:[#allocation7 + $0x18] sm:$0xff]  ;;  %v130_v18 = vld [vmem:[#allocation5 + $0x30] sm:$0xff]  ;;  %v222_v23 = vld [vmem:[#allocation7 + $0x20] sm:$0xff]  ;;  %v112_v4 = vshrl.u32 %v111_v3, 7  ;;  %p756_p4 = scmp.ne.s32.totalorder %s414_s22, %s755_s23  ;;  %p761_p6 = scmp.lt.s32.totalorder %s755_s23, %s755_s23 }
  0x4e   :  { %586 = vmatprep.subr.bf16.mxu0 %v791_v0  ;;  %v131_v19 = vld [vmem:[#allocation5 + $0x38] sm:$0xff]  ;;  %v88_v20 = vadd.f32 %v87_v11, %v909_v10  ;;  %v611_v21 = vpack.c.bf16 %v221_v17, %v220_v16  ;;  %v223_v24 = vld [vmem:[#allocation7 + $0x28] sm:$0xff]  ;;  %v132_v26 = vld [vmem:[#allocation5 + $0x40] sm:$0xff] }
  0x4f   :  { %609 = vmatpush3.bf16.msra.mxu1 %v608_v15  ;;  %v593_v25 = vpack.c.bf16 %v131_v19, %v130_v18  ;;  %v133_v27 = vld [vmem:[#allocation5 + $0x48] sm:$0xff]  ;;  %v614_v29 = vpack.c.bf16 %v223_v24, %v222_v23  ;;  %v224_v31 = vld [vmem:[#allocation7 + $0x30] sm:$0xff]  ;;  %v225_v32 = vld [vmem:[#allocation7 + $0x38] sm:$0xff]  ;;  %v113_v6 = vsub.s32 0, %v112_v4  ;;  %p762_p7 = por %p761_p6, %p760_p5 }
  0x50   :  { %v89_v22 = vrot.slane %v88_v20, 2  ;;  %610 = vmatprep.subr.bf16.mxu1 %v791_v0  ;;  %v596_v33 = vpack.c.bf16 %v133_v27, %v132_v26  ;;  %v134_v34 = vld [vmem:[#allocation5 + $0x50] sm:$0xff]  ;;  %v135_v35 = vld [vmem:[#allocation5 + $0x58] sm:$0xff]  ;;  %v617_v37 = vpack.c.bf16 %v225_v32, %v224_v31  ;;  %v226_v39 = vld [vmem:[#allocation7 + $0x40] sm:$0xff] }
  0x51   :  { %588 = vmatpush3.bf16.msra.mxu0 %v587_v7  ;;  %v227_v40 = vld [vmem:[#allocation7 + $0x48] sm:$0xff]  ;;  %v599_v41 = vpack.c.bf16 %v135_v35, %v134_v34  ;;  %v136_v42 = vld [vmem:[#allocation5 + $0x60] sm:$0xff]  ;;  %v228_v47 = vld [vmem:[#allocation7 + $0x50] sm:$0xff]  ;;  %p763_p8 = pnand %p762_p7, %p756_p4 }
  0x52   :  { %589 = vmatprep.subr.bf16.mxu0 %v791_v0  ;;  %v90_v28 = vadd.f32 %v89_v22, %v88_v20  ;;  %v137_v43 = vld [vmem:[#allocation5 + $0x68] sm:$0xff]  ;;  %v620_v45 = vpack.c.bf16 %v227_v40, %v226_v39  ;;  %v229_v48 = vld [vmem:[#allocation7 + $0x58] sm:$0xff]  ;;  %v138_v50 = vld [vmem:[#allocation5 + $0x70] sm:$0xff] }
  0x53   :  { %612 = vmatpush3.bf16.msra.mxu1 %v611_v21  ;;  %v602_v49 = vpack.c.bf16 %v137_v43, %v136_v42  ;;  %v139_v51 = vld [vmem:[#allocation5 + $0x78] sm:$0xff]  ;;  %v623_v53 = vpack.c.bf16 %v229_v48, %v228_v47  ;;  %v230_v55 = vld [vmem:[#allocation7 + $0x60] sm:$0xff]  ;;  %v231_v56 = vld [vmem:[#allocation7 + $0x68] sm:$0xff] }
  0x54   :  { %v91_v30 = vrot.slane %v90_v28, 1  ;;  %613 = vmatprep.subr.bf16.mxu1 %v791_v0  ;;  %v605_v57 = vpack.c.bf16 %v139_v51, %v138_v50  ;;  %v626_v59 = vpack.c.bf16 %v231_v56, %v230_v55  ;;  %v105_v5 = vld [vmem:[%s966_s1] sm:$0x1]  ;;  %v232_v17 = vld [vmem:[#allocation7 + $0x70] sm:$0xff]  ;;  %v312_v20 = vld [vmem:[#allocation8] sm:$0xff] }
  0x55   :  { %591 = vmatpush3.bf16.msra.mxu0 %v590_v14  ;;  %v107_v9 = vld [vmem:[%s967_s2] sm:$0x1]  ;;  %v313_v21 = vld [vmem:[#allocation8 + $0x8] sm:$0xff]  ;;  %v314_v22 = vld [vmem:[#allocation8 + $0x10] sm:$0xff] }
  0x56   :  { %592 = vmatprep.subr.bf16.mxu0 %v791_v0  ;;  %v92_v36 = vadd.f32 %v91_v30, %v90_v28  ;;  %v233_v18 = vld [vmem:[#allocation7 + $0x78] sm:$0xff]  ;;  %v632_v23 = vpack.c.bf16 %v313_v21, %v312_v20  ;;  %v317_v26 = vld [vmem:[#allocation8 + $0x28] sm:$0xff]  ;;  %v320_v30 = vld [vmem:[#allocation8 + $0x40] sm:$0xff] }
  0x57   :  { %615 = vmatpush3.bf16.msra.mxu1 %v614_v29  ;;  %v629_v19 = vpack.c.bf16 %v233_v18, %v232_v17  ;;  %v315_v24 = vld [vmem:[#allocation8 + $0x18] sm:$0xff]  ;;  %v321_v31 = vld [vmem:[#allocation8 + $0x48] sm:$0xff] }
  0x58   :  { %v93_v38 = vmul.f32 0.125, %v92_v36  ;;  %616 = vmatprep.subr.bf16.mxu1 %v791_v0  ;;  %v319_v28 = vld [vmem:[#allocation8 + $0x38] sm:$0xff]  ;;  %v644_v32 = vpack.c.bf16 %v321_v31, %v320_v30  ;;  %v324_v36 = vld [vmem:[#allocation8 + $0x60] sm:$0xff] }
  0x59   :  { %594 = vmatpush3.bf16.msra.mxu0 %v593_v25  ;;  %v635_v25 = vpack.c.bf16 %v315_v24, %v314_v22  ;;  %v323_v34 = vld [vmem:[#allocation8 + $0x58] sm:$0xff] }
  0x5a   :  { %595 = vmatprep.subr.bf16.mxu0 %v791_v0  ;;  %v94_v44 = vsub.f32 %v909_v10, %v93_v38  ;;  %v424_v39 = vld [vmem:[%s969_s4] ss:$0 sm:$0xff] }
  0x5b   :  { %618 = vmatpush3.bf16.msra.mxu1 %v617_v37  ;;  %v325_v37 = vld [vmem:[#allocation8 + $0x68] sm:$0xff]  ;;  %v425_v47 = vld [vmem:[%s971_s6] ss:$0 sm:$0xff] }
  0x5c   :  { %v95_v46 = vmul.f32 %v94_v44, %v94_v44  ;;  %619 = vmatprep.subr.bf16.mxu1 %v791_v0  ;;  %v326_v44 = vld [vmem:[#allocation8 + $0x70] sm:$0xff]  ;;  %v426_v51 = vld [vmem:[%s973_s8] ss:$0 sm:$0xff] }
  0x5d   :  { %597 = vmatpush3.bf16.msra.mxu0 %v596_v33  ;;  %v322_v33 = vld [vmem:[#allocation8 + $0x50] sm:$0xff] }
  0x5e   :  { %598 = vmatprep.subr.bf16.mxu0 %v791_v0  ;;  %v96_v52 = vrot.slane %v95_v46, 4  ;;  %v647_v35 = vpack.c.bf16 %v323_v34, %v322_v33 }
  0x5f   :  { %621 = vmatpush3.bf16.msra.mxu1 %v620_v45  ;;  %v327_v45 = vld [vmem:[#allocation8 + $0x78] sm:$0xff] }
  0x60   :  { %v97_v54 = vadd.f32 %v96_v52, %v95_v46  ;;  %622 = vmatprep.subr.bf16.mxu1 %v791_v0  ;;  %v653_v46 = vpack.c.bf16 %v327_v45, %v326_v44 }
  0x61   :  { %600 = vmatpush3.bf16.msra.mxu0 %v599_v41 }
  0x62   :  { %601 = vmatprep.subr.bf16.mxu0 %v791_v0  ;;  %v98_v58 = vrot.slane %v97_v54, 2 }
  0x63   :  { %624 = vmatpush3.bf16.msra.mxu1 %v623_v53 }
  0x64   :  { %v99_v60 = vadd.f32 %v98_v58, %v97_v54  ;;  %625 = vmatprep.subr.bf16.mxu1 %v791_v0 }
  0x65   :  { %603 = vmatpush3.bf16.msra.mxu0 %v602_v49 }
  0x66   :  { %604 = vmatprep.subr.bf16.mxu0 %v791_v0  ;;  %v100_v61 = vrot.slane %v99_v60, 1 }
  0x67   :  { %627 = vmatpush3.bf16.msra.mxu1 %v626_v59 }
  0x68   :  { %v101_v62 = vadd.f32 %v100_v61, %v99_v60  ;;  %628 = vmatprep.subr.bf16.mxu1 %v791_v0 }
  0x69   :  { %606 = vmatpush3.bf16.msra.mxu0 %v605_v57 }
  0x6a   :  { %631 = vmatprep.subr.bf16.mxu0 %v791_v0  ;;  %v102_v63 = vmul.f32 0.125, %v101_v62 }
  0x6b   :  { %630 = vmatpush3.bf16.msra.mxu1 %v629_v19 }
  0x6c   :  { %v103_v2 = vadd.f32 1e-05, %v102_v63 }
  0x6e   :  { %665 = vrsqrt.f32 %v103_v2 }
  0x78   :  { %v666_v7 = vpop.eup %665 }
  0x79   :  { %v106_v8 = vmul.f32 %v666_v7, %v105_v5 }
  0x7b   :  { %v108_v11 = vmul.f32 %v106_v8, %v93_v38  ;;  %v114_v12 = vrot.slane %v106_v8, %v113_v6  ;;  %v650_v38 = vpack.c.bf16 %v325_v37, %v324_v36 }
  0x7d   :  { %v109_v13 = vsub.f32 %v107_v9, %v108_v11  ;;  %v116_v14 = vmul.f32 %v114_v12, %v909_v10  ;;  %v316_v10 = vld [vmem:[#allocation8 + $0x20] sm:$0xff] }
  0x7e   :  { %v638_v27 = vpack.c.bf16 %v317_v26, %v316_v10 }
  0x7f   :  { %v121_v15 = vrot.slane %v109_v13, %v113_v6 }
  0x81   :  { %v123_v16 = vadd.f32 %v121_v15, %v116_v14 }
  0x83   :  { %511 = vmatmul.mubr.f32.vlgmr.msra.gmra.mrb[0].mxu0 %v123_v16 }
  0x84   :  { %580 = vmatprep.mubr.msk.f32.mxu0 %vm792_vm0, %v793_v1  ;;  %633 = vmatpush3.bf16.msra.mxu0 %v632_v23  ;;  %v318_v1 = vld [vmem:[#allocation8 + $0x30] sm:$0xff] }
  0x85   :  { %634 = vmatprep.subr.bf16.mxu0 %v791_v0  ;;  %v641_v29 = vpack.c.bf16 %v319_v28, %v318_v1 }
  0x88   :  { %636 = vmatpush3.bf16.msra.mxu0 %v635_v25 }
  0x89   :  { %637 = vmatprep.subr.bf16.mxu0 %v791_v0 }
  0x8c   :  { %639 = vmatpush3.bf16.msra.mxu0 %v638_v27 }
  0x8d   :  { %640 = vmatprep.subr.bf16.mxu0 %v791_v0 }
  0x90   :  { %642 = vmatpush3.bf16.msra.mxu0 %v641_v29 }
  0x91   :  { %643 = vmatprep.subr.bf16.mxu0 %v791_v0 }
  0x94   :  { %645 = vmatpush3.bf16.msra.mxu0 %v644_v32 }
  0x95   :  { %646 = vmatprep.subr.bf16.mxu0 %v791_v0 }
  0x98   :  { %648 = vmatpush3.bf16.msra.mxu0 %v647_v35 }
  0x99   :  { %649 = vmatprep.subr.bf16.mxu0 %v791_v0 }
  0x9c   :  { %651 = vmatpush3.bf16.msra.mxu0 %v650_v38 }
  0x9d   :  { %652 = vmatprep.subr.bf16.mxu0 %v791_v0 }
  0xa0   :  { %654 = vmatpush3.bf16.msra.mxu0 %v653_v46 }
 0x156   :  { %v213_v40 = vpop.f32.mrb[0].mxu0 }
 0x157   :  { %v214_v41 = vadd.f32 %v424_v39, %v213_v40  ;;  %v512_v42 = vpop.f32.mrb[1].mxu0 }
 0x159   :  { %v217_v43 = vmax.f32 %v214_v41, 0.0 }
 0x15b   :  { %546 = vmatmul.mubr.f32.vlgmr.msra.gmra.mrb[0].mxu1 %v217_v43 }
 0x22e   :  { %v307_v48 = vpop.f32.mrb[0].mxu1 }
 0x22f   :  { %v308_v49 = vadd.f32 %v425_v47, %v307_v48  ;;  %v547_v0 = vpop.f32.mrb[1].mxu1 }
 0x231   :  { %v311_v50 = vmax.f32 %v308_v49, 0.0 }
 0x233   :  { %581 = vmatmul.mubr.f32.vlgmr.msra.gmra.mrb[2].mxu0 %v311_v50 }
 0x306   :  { %v401_v52 = vpop.f32.mrb[2].mxu0 }
 0x307   :  { %v402_v53 = vadd.f32 %v426_v51, %v401_v52  ;;  %v582_v54 = vpop.f32.mrb[3].mxu0 }
 0x309   :  { %v405_v55 = vmax.f32 %v402_v53, 0.0 }
 0x30b   :  { %406 = vst [vmem:[#allocation10] sm:$0xff] %v405_v55 }
 0x30c   :  { %766 = shalt.err (!%p763_p8)
}
 0x30d   :  { %s767_s0 = scalar_lea.hbm %s974_s9, 128 }
 0x30e   :  { %p768_p9 = scmp.ne.s32.totalorder %s974_s9, %s767_s0  ;;  %p771_p10 = scmp.lt.u32.totalorder %s767_s0, %s974_s9 }
 0x310   :  { %p773_p11 = pnand %p771_p10, %p768_p9 }
 0x312   :  { %776 = shalt.err (!%p773_p11)
}
 0x313   :  { %416 = dma.vmem_to_hbm [thread:$0]  %s414_s22, 128, %s974_s9, [#allocation4]  }
 0x314   :  { %783 = dma.done.wait [#allocation4], 128  }
 0x315   :  { %784 = vsyncadd [#allocation4], 4294967168 }
 0x316   :  { %420 = vsyncpa [#allocation3], 1 }
 0x317   :  { %421 = vsyncpa [#allocation6], 1 }
 0x318   :  { %422 = vsyncpa [#allocation9], 1 }
 0x319   :  { %423 = vsyncpa [#allocation4], 1 }

</bundles_post_ra>
